<compile_context>
chip_gen: v6e
topology: v6e:2x2x1
jax: 0.10.0
libtpu: 0.0.40
codegen_flags: <defaults>
</compile_context>

<pallas_src>
import jax
import jax.numpy as jnp
from jax.experimental import pallas as pl
from jax.experimental.pallas import tpu as pltpu


def _round_up(a, m):
    return (a + m - 1) // m * m


def mlp_kernel(x_ref, w1_ref, b1_ref, w2_ref, b2_ref,
               w3_ref, b3_ref, w4_ref, b4_ref, o_ref):
    # Layer 1: (tb,273)bf16 @ (273,128)bf16 -> f32 acc, + bias, ReLU.
    # TODO(synk): 273 input features pad to 2 K-chunks on the 256-deep v6e/v7x
    # MXU (~2x layer-1 cost); trimming features to <=256 is a data-level win.
    h = jnp.dot(x_ref[...], w1_ref[...], preferred_element_type=jnp.float32)
    h = jnp.maximum(h + b1_ref[...], 0.0)
    # Layer 2: (tb,128) @ (128,64).
    h = jnp.dot(h.astype(jnp.bfloat16), w2_ref[...],
                preferred_element_type=jnp.float32)
    h = jnp.maximum(h + b2_ref[...], 0.0)
    # Layer 3: (tb,64) @ (64,128).  Output dim zero-padded 32->128 in the
    # wrapper (cols 32..127 are relu(0 + 0) = 0); same MXU cost as N=32.
    h = jnp.dot(h.astype(jnp.bfloat16), w3_ref[...],
                preferred_element_type=jnp.float32)
    h = jnp.maximum(h + b3_ref[...], 0.0)                    # (tb, 128) f32
    # Layer 4 (32 -> 1) on XLU + VPU, no MXU pass:
    #   transpose to (128, tb), scale by w4 (128,1) broadcast over lanes,
    #   sublane-reduce -> lane-dense (1, tb) row (unmasked contiguous store).
    ht = h.T                                                  # (128, tb) f32
    row = jnp.sum(ht * w4_ref[...], axis=0, keepdims=True)    # (1, tb)  f32
    o_ref[...] = (row + b4_ref[...])[None]                    # (1, 1, tb)


def mlp_forward(x, params, *, tb_max=2048, vmem_limit_bytes=None):
    """x: (B, 273) float32. params: dict of (in,out) weights / (1,out) biases.

    tb_max: max rows per grid step (balanced tiles are derived from it).
    2048 is safe on v5e/v6e/v7x; raise on v6e (with vmem_limit_bytes) for
    very large batches.
    """
    B, F = x.shape

    # Balanced batch tiles: minimum number of <= tb_max tiles, (8-aligned)
    # nearly-equal size, so padding waste is < 8 rows per tile.
    b8 = _round_up(B, 8)
    n_tiles = pl.cdiv(b8, tb_max)
    tb = _round_up(pl.cdiv(b8, n_tiles), 8)
    bp = tb * n_tiles
    if bp != B:
        x = jnp.pad(x, ((0, bp - B), (0, 0)))

    # bf16 streamed input + bf16 MXU weights (f32 accumulation); f32 biases.
    x_bf = x.astype(jnp.bfloat16)
    w1 = params["w1"].astype(jnp.bfloat16)
    b1 = params["b1"].astype(jnp.float32)
    w2 = params["w2"].astype(jnp.bfloat16)
    b2 = params["b2"].astype(jnp.float32)
    # Layer-3 out dim zero-padded 32 -> 128 so layer 4's transpose is a fully
    # aligned (tb,128) -> (128,tb) f32 transpose.  w4 padded to (128,1).
    w3 = jnp.pad(params["w3"], ((0, 0), (0, 96))).astype(jnp.bfloat16)
    b3 = jnp.pad(params["b3"], ((0, 0), (0, 96))).astype(jnp.float32)
    w4 = jnp.pad(params["w4"], ((0, 96), (0, 0))).astype(jnp.float32)
    b4 = params["b4"].astype(jnp.float32)

    weights = (w1, b1, w2, b2, w3, b3, w4, b4)

    const2 = lambda i: (0, 0)               # weights/biases: VMEM-resident
    in_specs = [pl.BlockSpec((tb, F), lambda i: (i, 0))]
    in_specs += [pl.BlockSpec(w.shape, const2) for w in weights]

    # Advisory cost hint for XLA scheduling around the custom call.
    flops = 2 * bp * (273 * 128 + 128 * 64 + 64 * 32 + 32 * 1)
    bytes_accessed = (x_bf.size * 2 + bp * 4
                      + sum(int(w.size) * w.dtype.itemsize for w in weights))

    out = pl.pallas_call(
        mlp_kernel,
        out_shape=jax.ShapeDtypeStruct((n_tiles, 1, tb), jnp.float32),
        grid=(n_tiles,),
        in_specs=in_specs,
        # Lane-dense (1, tb) output block: unmasked vst, tiny VMEM block,
        # contiguous writeback DMA.
        out_specs=pl.BlockSpec((1, 1, tb), lambda i: (i, 0, 0)),
        compiler_params=pltpu.CompilerParams(
            dimension_semantics=("parallel",),
            vmem_limit_bytes=vmem_limit_bytes),
        cost_estimate=pl.CostEstimate(
            flops=flops, transcendentals=0, bytes_accessed=bytes_accessed),
    )(x_bf, *weights)

    # (n_tiles, 1, tb) row-major == batch order -> (B, 1).
    return out.reshape(bp, 1)[:B]


def init_params(key):
    """Deterministic init mimicking torch.nn.Linear (uniform +/- 1/sqrt(fan_in)).
    Weights stored transposed as (in, out); biases as (1, out)."""
    dims = [(273, 128), (128, 64), (64, 32), (32, 1)]
    params = {}
    keys = jax.random.split(key, 2 * len(dims))
    for i, (fan_in, fan_out) in enumerate(dims):
        bound = 1.0 / jnp.sqrt(jnp.float32(fan_in))
        params[f"w{i + 1}"] = jax.random.uniform(
            keys[2 * i], (fan_in, fan_out), jnp.float32, -bound, bound)
        params[f"b{i + 1}"] = jax.random.uniform(
            keys[2 * i + 1], (1, fan_out), jnp.float32, -bound, bound)
    return params


def mlp_reference(x, params):
    """f32 reference with the same bf16 casts the kernel applies."""
    bf = lambda a: a.astype(jnp.bfloat16).astype(jnp.float32)
    h = jnp.maximum(bf(x) @ bf(params["w1"]) + params["b1"], 0.0)
    h = jnp.maximum(bf(h) @ bf(params["w2"]) + params["b2"], 0.0)
    h = jnp.maximum(bf(h) @ bf(params["w3"]) + params["b3"], 0.0)
    return h @ params["w4"] + params["b4"]


if __name__ == "__main__":
    key = jax.random.PRNGKey(0)
    pkey, xkey = jax.random.split(key)
    params = init_params(pkey)

    # Small shapes: B=2 (tiny), B=13 (batch-padding path), B=300 with
    # tb_max=128 (multi-tile grid + balanced-tile path).
    for B, tb_max in ((2, 2048), (13, 2048), (300, 128)):
        x = jax.random.normal(xkey, (B, 273), jnp.float32)
        out = jax.block_until_ready(mlp_forward(x, params, tb_max=tb_max))
        ref = mlp_reference(x, params)
        assert out.shape == (B, 1), out.shape
        err = float(jnp.max(jnp.abs(out - ref)))
        # bf16 inputs/weights + bf16 intermediate casts -> loose tolerance;
        # accumulation stays f32 so the error is bounded.
        assert err < 5e-2, ("mismatch vs reference", err)

    print("KERNEL_OK")
</pallas_src>

<mosaic_0001>
module attributes {stable_mosaic.version = 11 : i64} {
  func.func @mlp_kernel(%arg0: i32, %arg1: memref<8x273xbf16, #tpu.memory_space<vmem>>, %arg2: memref<273x128xbf16, #tpu.memory_space<vmem>>, %arg3: memref<1x128xf32, #tpu.memory_space<vmem>>, %arg4: memref<128x64xbf16, #tpu.memory_space<vmem>>, %arg5: memref<1x64xf32, #tpu.memory_space<vmem>>, %arg6: memref<64x128xbf16, #tpu.memory_space<vmem>>, %arg7: memref<1x128xf32, #tpu.memory_space<vmem>>, %arg8: memref<128x1xf32, #tpu.memory_space<vmem>>, %arg9: memref<1x1xf32, #tpu.memory_space<vmem>>, %arg10: memref<1x1x8xf32, #tpu.memory_space<vmem>>) attributes {dimension_semantics = [#tpu.dimension_semantics<parallel>], iteration_bounds = array<i64: 1>, scalar_prefetch = 0 : i64, scratch_operands = 0 : i64, tpu.core_type = #tpu.core_type<tc>, window_params = [{transform_indices = @transform_0, window_bounds = array<i64: 8, 273>}, {pipeline_mode = #tpu.pipeline_mode<synchronous>, transform_indices = @transform_1, window_bounds = array<i64: 273, 128>}, {pipeline_mode = #tpu.pipeline_mode<synchronous>, transform_indices = @transform_2, window_bounds = array<i64: 1, 128>}, {pipeline_mode = #tpu.pipeline_mode<synchronous>, transform_indices = @transform_3, window_bounds = array<i64: 128, 64>}, {pipeline_mode = #tpu.pipeline_mode<synchronous>, transform_indices = @transform_4, window_bounds = array<i64: 1, 64>}, {pipeline_mode = #tpu.pipeline_mode<synchronous>, transform_indices = @transform_5, window_bounds = array<i64: 64, 128>}, {pipeline_mode = #tpu.pipeline_mode<synchronous>, transform_indices = @transform_6, window_bounds = array<i64: 1, 128>}, {pipeline_mode = #tpu.pipeline_mode<synchronous>, transform_indices = @transform_7, window_bounds = array<i64: 128, 1>}, {pipeline_mode = #tpu.pipeline_mode<synchronous>, transform_indices = @transform_8, window_bounds = array<i64: 1, 1>}, {transform_indices = @transform_9, window_bounds = array<i64: 1, 1, 8>}]} {
    %c0 = arith.constant 0 : index
    %c0_0 = arith.constant 0 : index
    %0 = vector.load %arg1[%c0, %c0_0] : memref<8x273xbf16, #tpu.memory_space<vmem>>, vector<8x273xbf16>
    %c0_1 = arith.constant 0 : index
    %c0_2 = arith.constant 0 : index
    %1 = vector.load %arg2[%c0_1, %c0_2] : memref<273x128xbf16, #tpu.memory_space<vmem>>, vector<273x128xbf16>
    %cst = arith.constant dense<0.000000e+00> : vector<8x128xf32>
    %2 = tpu.matmul %0, %1, %cst {dimension_numbers = #tpu.dot_dimension_numbers<[1], [0], [0], [1], [0, 0, 1, 1], [], []>} : vector<8x273xbf16>, vector<273x128xbf16>, vector<8x128xf32> -> vector<8x128xf32>
    %c0_3 = arith.constant 0 : index
    %c0_4 = arith.constant 0 : index
    %3 = vector.load %arg3[%c0_3, %c0_4] : memref<1x128xf32, #tpu.memory_space<vmem>>, vector<1x128xf32>
    %4 = vector.broadcast %3 : vector<1x128xf32> to vector<8x128xf32>
    %5 = arith.addf %2, %4 : vector<8x128xf32>
    %cst_5 = arith.constant 0.000000e+00 : f32
    %6 = vector.broadcast %cst_5 : f32 to vector<8x128xf32>
    %7 = arith.maximumf %5, %6 : vector<8x128xf32>
    %8 = arith.truncf %7 : vector<8x128xf32> to vector<8x128xbf16>
    %c0_6 = arith.constant 0 : index
    %c0_7 = arith.constant 0 : index
    %9 = vector.load %arg4[%c0_6, %c0_7] : memref<128x64xbf16, #tpu.memory_space<vmem>>, vector<128x64xbf16>
    %cst_8 = arith.constant dense<0.000000e+00> : vector<8x64xf32>
    %10 = tpu.matmul %8, %9, %cst_8 {dimension_numbers = #tpu.dot_dimension_numbers<[1], [0], [0], [1], [0, 0, 1, 1], [], []>} : vector<8x128xbf16>, vector<128x64xbf16>, vector<8x64xf32> -> vector<8x64xf32>
    %c0_9 = arith.constant 0 : index
    %c0_10 = arith.constant 0 : index
    %11 = vector.load %arg5[%c0_9, %c0_10] : memref<1x64xf32, #tpu.memory_space<vmem>>, vector<1x64xf32>
    %12 = vector.broadcast %11 : vector<1x64xf32> to vector<8x64xf32>
    %13 = arith.addf %10, %12 : vector<8x64xf32>
    %cst_11 = arith.constant 0.000000e+00 : f32
    %14 = vector.broadcast %cst_11 : f32 to vector<8x64xf32>
    %15 = arith.maximumf %13, %14 : vector<8x64xf32>
    %16 = arith.truncf %15 : vector<8x64xf32> to vector<8x64xbf16>
    %c0_12 = arith.constant 0 : index
    %c0_13 = arith.constant 0 : index
    %17 = vector.load %arg6[%c0_12, %c0_13] : memref<64x128xbf16, #tpu.memory_space<vmem>>, vector<64x128xbf16>
    %cst_14 = arith.constant dense<0.000000e+00> : vector<8x128xf32>
    %18 = tpu.matmul %16, %17, %cst_14 {dimension_numbers = #tpu.dot_dimension_numbers<[1], [0], [0], [1], [0, 0, 1, 1], [], []>} : vector<8x64xbf16>, vector<64x128xbf16>, vector<8x128xf32> -> vector<8x128xf32>
    %c0_15 = arith.constant 0 : index
    %c0_16 = arith.constant 0 : index
    %19 = vector.load %arg7[%c0_15, %c0_16] : memref<1x128xf32, #tpu.memory_space<vmem>>, vector<1x128xf32>
    %20 = vector.broadcast %19 : vector<1x128xf32> to vector<8x128xf32>
    %21 = arith.addf %18, %20 : vector<8x128xf32>
    %cst_17 = arith.constant 0.000000e+00 : f32
    %22 = vector.broadcast %cst_17 : f32 to vector<8x128xf32>
    %23 = arith.maximumf %21, %22 : vector<8x128xf32>
    %24 = tpu.transpose %23, [1, 0] : vector<8x128xf32> -> vector<128x8xf32>
    %c0_18 = arith.constant 0 : index
    %c0_19 = arith.constant 0 : index
    %25 = vector.load %arg8[%c0_18, %c0_19] : memref<128x1xf32, #tpu.memory_space<vmem>>, vector<128x1xf32>
    %26 = vector.broadcast %25 : vector<128x1xf32> to vector<128x8xf32>
    %27 = arith.mulf %24, %26 : vector<128x8xf32>
    %cst_20 = arith.constant dense<0.000000e+00> : vector<8xf32>
    %28 = vector.multi_reduction <add>, %27, %cst_20 [0] : vector<128x8xf32> to vector<8xf32>
    %29 = vector.shape_cast %28 : vector<8xf32> to vector<1x8xf32>
    %c0_21 = arith.constant 0 : index
    %c0_22 = arith.constant 0 : index
    %30 = vector.load %arg9[%c0_21, %c0_22] : memref<1x1xf32, #tpu.memory_space<vmem>>, vector<1x1xf32>
    %31 = vector.broadcast %30 : vector<1x1xf32> to vector<1x8xf32>
    %32 = arith.addf %29, %31 : vector<1x8xf32>
    %33 = vector.shape_cast %32 : vector<1x8xf32> to vector<1x1x8xf32>
    %c0_23 = arith.constant 0 : index
    %c0_24 = arith.constant 0 : index
    %c0_25 = arith.constant 0 : index
    %34 = vector.load %arg10[%c0_23, %c0_24, %c0_25] : memref<1x1x8xf32, #tpu.memory_space<vmem>>, vector<1x1x8xf32>
    tpu.vector_store %arg10[%c0_23, %c0_24, %c0_25], %33 {strides = array<i32>} : memref<1x1x8xf32, #tpu.memory_space<vmem>>, vector<1x1x8xf32>,
    return
  }
  func.func @transform_0(%arg0: i32) -> (i32, i32) {
    %c0_i32 = arith.constant 0 : i32
    %c0_i32_0 = arith.constant 0 : i32
    return %arg0, %c0_i32 : i32, i32
  }
  func.func @transform_1(%arg0: i32) -> (i32, i32) {
    %c0_i32 = arith.constant 0 : i32
    %c0_i32_0 = arith.constant 0 : i32
    %c0_i32_1 = arith.constant 0 : i32
    return %c0_i32, %c0_i32_0 : i32, i32
  }
  func.func @transform_2(%arg0: i32) -> (i32, i32) {
    %c0_i32 = arith.constant 0 : i32
    %c0_i32_0 = arith.constant 0 : i32
    %c0_i32_1 = arith.constant 0 : i32
    return %c0_i32, %c0_i32_0 : i32, i32
  }
  func.func @transform_3(%arg0: i32) -> (i32, i32) {
    %c0_i32 = arith.constant 0 : i32
    %c0_i32_0 = arith.constant 0 : i32
    %c0_i32_1 = arith.constant 0 : i32
    return %c0_i32, %c0_i32_0 : i32, i32
  }
  func.func @transform_4(%arg0: i32) -> (i32, i32) {
    %c0_i32 = arith.constant 0 : i32
    %c0_i32_0 = arith.constant 0 : i32
    %c0_i32_1 = arith.constant 0 : i32
    return %c0_i32, %c0_i32_0 : i32, i32
  }
  func.func @transform_5(%arg0: i32) -> (i32, i32) {
    %c0_i32 = arith.constant 0 : i32
    %c0_i32_0 = arith.constant 0 : i32
    %c0_i32_1 = arith.constant 0 : i32
    return %c0_i32, %c0_i32_0 : i32, i32
  }
  func.func @transform_6(%arg0: i32) -> (i32, i32) {
    %c0_i32 = arith.constant 0 : i32
    %c0_i32_0 = arith.constant 0 : i32
    %c0_i32_1 = arith.constant 0 : i32
    return %c0_i32, %c0_i32_0 : i32, i32
  }
  func.func @transform_7(%arg0: i32) -> (i32, i32) {
    %c0_i32 = arith.constant 0 : i32
    %c0_i32_0 = arith.constant 0 : i32
    %c0_i32_1 = arith.constant 0 : i32
    return %c0_i32, %c0_i32_0 : i32, i32
  }
  func.func @transform_8(%arg0: i32) -> (i32, i32) {
    %c0_i32 = arith.constant 0 : i32
    %c0_i32_0 = arith.constant 0 : i32
    %c0_i32_1 = arith.constant 0 : i32
    return %c0_i32, %c0_i32_0 : i32, i32
  }
  func.func @transform_9(%arg0: i32) -> (i32, i32, i32) {
    %c0_i32 = arith.constant 0 : i32
    %c0_i32_0 = arith.constant 0 : i32
    %c0_i32_1 = arith.constant 0 : i32
    return %arg0, %c0_i32, %c0_i32_0 : i32, i32, i32
  }
}

</mosaic_0001>

<bundles_post_ra>
// kernel: tpu_custom_call.1
= control target key start
LH: loop header
LB: loop body
LE: loop exit
PB: predicated region body
PF: predicated region fallthrough
CT: control target
= control target key end

     0   :  { %s1123_s0 = inlined_call_operand.vmem [shape: bf16[8,273], index: 0, kind: input, shape index: {}]   ;;  %s1124_s1 = inlined_call_operand.vmem [shape: bf16[273,128], index: 1, kind: input, shape index: {}]   ;;  %s1125_s2 = inlined_call_operand.vmem [shape: f32[1,128], index: 2, kind: input, shape index: {}]   ;;  %s1126_s3 = inlined_call_operand.vmem [shape: bf16[128,64], index: 3, kind: input, shape index: {}]   ;;  %s1127_s4 = inlined_call_operand.vmem [shape: f32[1,64], index: 4, kind: input, shape index: {}]   ;;  %s1128_s5 = inlined_call_operand.vmem [shape: bf16[64,128], index: 5, kind: input, shape index: {}]   ;;  %s1129_s6 = inlined_call_operand.vmem [shape: f32[1,128], index: 6, kind: input, shape index: {}]   ;;  %s1130_s7 = inlined_call_operand.vmem [shape: f32[128,1], index: 7, kind: input, shape index: {}]   ;;  %s1131_s8 = inlined_call_operand.<no memory space> [shape: f32[1,1], index: 8, kind: input, shape index: {}]   ;;  %s1132_s9 = inlined_call_operand.hbm [shape: f32[1,1,8], index: 9, kind: output, shape index: {}]  }
   0x1   :  { %v14_v0 = vstv %s1131_s8 }
   0x2   :  { %15 = vst [vmem:[#allocation2] sm:$0x1] %v14_v0 }
   0x3   :  { %v816_v1 = vld [vmem:[%s1124_s1 + $0x78] sm:$0xff]   ;;  %v871_v3 = vmov 0.0   ;;  %v818_v4 = vld [vmem:[%s1124_s1 + $0x70] sm:$0xff]   ;;  %v872_v6 = vmov 0   ;;  %v820_v7 = vld [vmem:[%s1124_s1 + $0x68] sm:$0xff]   ;;  %vm873_vm0 = vmmov 0  }
   0x4   :  { %v817_v2 = vld [vmem:[%s1124_s1 + $0x38] sm:$0xff]   ;;  %770 = vmatprep.subr.bf16.mxu1 %v871_v3  ;;  %731 = vmatprep.subr.bf16.mxu0 %v816_v1  ;;  %v819_v5 = vld [vmem:[%s1124_s1 + $0x30] sm:$0xff]   ;;  %v821_v8 = vld [vmem:[%s1124_s1 + $0x28] sm:$0xff]   ;;  %vm199_vm1 = vcmask 1040384   ;;  %vm195_vm2 = vcmask 138240  }
   0x5   :  { %732 = vmatpush3.bf16.msra.mxu0 %v817_v2  ;;  %815 = vset.pattern.permute.xlu1 %v872_v6  ;;  %v822_v9 = vld [vmem:[%s1124_s1 + $0x60] sm:$0xff]   ;;  %v824_v11 = vld [vmem:[%s1124_s1 + $0x58] sm:$0xff]   ;;  %v201_v12 = vsel %vm199_vm1, 65535, %v872_v6  ;;  %v830_v14 = vld [vmem:[%s1124_s1 + $0x88] ss:$0 sps:$4 sm:$0x11]  }
   0x6   :  { %733 = vmatprep.subr.bf16.mxu0 %v818_v4  ;;  %774 = vmatprep.mubr.msk.bf16.mxu1 %vm873_vm0, %v871_v3  ;;  %v823_v10 = vld [vmem:[%s1124_s1 + $0x20] sm:$0xff]   ;;  %v825_v13 = vld [vmem:[%s1124_s1 + $0x18] sm:$0xff]   ;;  %v826_v15 = vld [vmem:[%s1124_s1 + $0x50] sm:$0xff]   ;;  %v203_v16 = vand.u32 %v830_v14, %v201_v12 }
   0x7   :  { %v36_v17 = vld [vmem:[%s1123_s0] sm:$0xff]  ;;  %v827_v20 = vld [vmem:[%s1124_s1 + $0x10] sm:$0xff]   ;;  %v828_v21 = vld [vmem:[%s1124_s1 + $0x48] sm:$0xff]  }
   0x8   :  { %771 = vmatpush3.bf16.msra.mxu1 %v203_v16  ;;  %v833_v18 = vld [vmem:[%s1124_s1 + $0x80] sm:$0xff]   ;;  %v695_v19 = vcombine.high %v36_v17, %v36_v17  ;;  %v829_v22 = vld [vmem:[%s1124_s1 + $0x8] sm:$0xff]   ;;  %v837_v24 = vld [vmem:[%s1126_s3 + $0x38] sm:$0xff]  }
   0x9   :  { %734 = vmatpush3.bf16.msra.mxu0 %v819_v5  ;;  %772 = vmatprep.subr.bf16.mxu1 %v871_v3  ;;  %v836_v23 = vld [vmem:[%s1123_s0 + $0x8] ss:$0 sps:$4 sm:$0xff]   ;;  %v831_v25 = vld [vmem:[%s1124_s1 + $0x40] sm:$0xff]   ;;  %v838_v26 = vld [vmem:[%s1126_s3 + $0x30] sm:$0xff]  }
   0xa   :  { %735 = vmatprep.subr.bf16.mxu0 %v820_v7  ;;  %237 = vmatprep.mubr.bf16.mxu0 %v695_v19  ;;  %v832_v27 = vld [vmem:[%s1124_s1] sm:$0xff]  }
   0xc   :  { %773 = vmatpush3.bf16.msra.mxu1 %v833_v18 }
   0xd   :  { %736 = vmatpush3.bf16.msra.mxu0 %v821_v8  ;;  %778 = vmatprep.subr.bf16.mxu1 %v871_v3 }
   0xe   :  { %737 = vmatprep.subr.bf16.mxu0 %v822_v9 }
   0xf   :  { %775 = vmatmul.mubr.msk.bf16.vlgmr.msra.gmra.mxu1 %vm195_vm2, %v836_v23 }
  0x10   :  { %779 = vmatpush3.bf16.msra.mxu1 %v837_v24  ;;  %794 = vmatprep.mubr.msk.bf16.mxu1 %vm873_vm0, %v871_v3 }
  0x11   :  { %738 = vmatpush3.bf16.msra.mxu0 %v823_v10  ;;  %780 = vmatprep.subr.bf16.mxu1 %v871_v3 }
  0x12   :  { %739 = vmatprep.subr.bf16.mxu0 %v824_v11 }
  0x15   :  { %740 = vmatpush3.bf16.msra.mxu0 %v825_v13 }
  0x16   :  { %741 = vmatprep.subr.bf16.mxu0 %v826_v15 }
  0x19   :  { %742 = vmatpush3.bf16.msra.mxu0 %v827_v20 }
  0x1a   :  { %743 = vmatprep.subr.bf16.mxu0 %v828_v21 }
  0x1d   :  { %744 = vmatpush3.bf16.msra.mxu0 %v829_v22 }
  0x1e   :  { %745 = vmatprep.subr.bf16.mxu0 %v831_v25 }
  0x1f   :  { %16 = vsyncpa [#allocation4], 0  ;;  %v694_v28 = vcombine.low %v36_v17, %v36_v17  ;;  %781 = vmatpush3.bf16.msra.mxu1 %v838_v26  ;;  %v839_v29 = vld [vmem:[%s1126_s3 + $0x28] sm:$0xff]   ;;  %v840_v30 = vld [vmem:[%s1126_s3 + $0x20] sm:$0xff]   ;;  %vm439_vm3 = vcmask 523264   ;;  %vm628_vm4 = vcmask 64512  }
  0x20   :  { %782 = vmatprep.subr.bf16.mxu1 %v871_v3  ;;  %v841_v31 = vld [vmem:[%s1126_s3 + $0x18] sm:$0xff]   ;;  %v842_v32 = vld [vmem:[%s1126_s3 + $0x10] sm:$0xff]   ;;  %v843_v33 = vld [vmem:[%s1126_s3 + $0x8] sm:$0xff]   ;;  %vm677_vm5 = vcmask 57344  }
  0x21   :  { %746 = vmatpush3.bf16.msra.mxu0 %v832_v27  ;;  %v844_v34 = vld [vmem:[%s1126_s3] sm:$0xff]   ;;  %v845_v35 = vld [vmem:[%s1128_s5 + $0x18] sm:$0xff]   ;;  %v846_v36 = vld [vmem:[%s1128_s5 + $0x10] sm:$0xff]  }
  0x22   :  { %798 = vmatprep.subr.bf16.mxu0 %v871_v3  ;;  %v693_v42 = vld [vmem:[%s1125_s2] ss:$0 sm:$0xff]  ;;  %v847_v51 = vld [vmem:[%s1128_s5 + $0x8] sm:$0xff]   ;;  %v518_v62 = vld [vmem:[%s1130_s7 + $0x10] sm:$0xff] }
  0x23   :  { %783 = vmatpush3.bf16.msra.mxu1 %v839_v29  ;;  %v848_v52 = vld [vmem:[%s1128_s5] sm:$0xff]   ;;  %v517_v61 = vld [vmem:[%s1130_s7 + $0x8] sm:$0xff]  ;;  %v519_v63 = vld [vmem:[%s1130_s7 + $0x18] sm:$0xff] }
  0x24   :  { %238 = vmatmul.mubr.bf16.vlgmr.msra.gmra.mxu0 %v694_v28  ;;  %784 = vmatprep.subr.bf16.mxu1 %v871_v3  ;;  %v716_v53 = vld [vmem:[%s1127_s4] ss:$0 sm:$0xff]  ;;  %v521_v1 = vld [vmem:[%s1130_s7 + $0x28] sm:$0xff]  ;;  %v522_v2 = vld [vmem:[%s1130_s7 + $0x30] sm:$0xff] }
  0x25   :  { %806 = vmatprep.mubr.msk.bf16.mxu0 %vm873_vm0, %v871_v3  ;;  %799 = vmatpush3.bf16.msra.mxu0 %v845_v35  ;;  %v520_v0 = vld [vmem:[%s1130_s7 + $0x20] sm:$0xff]  ;;  %v525_v5 = vld [vmem:[%s1130_s7 + $0x48] sm:$0xff]  ;;  %v526_v7 = vld [vmem:[%s1130_s7 + $0x50] sm:$0xff] }
  0x26   :  { %800 = vmatprep.subr.bf16.mxu0 %v871_v3  ;;  %539 = vperm.xlu1 %815, %v517_v61   ;;  %v524_v4 = vld [vmem:[%s1130_s7 + $0x40] sm:$0xff]  ;;  %v527_v8 = vld [vmem:[%s1130_s7 + $0x58] sm:$0xff]  ;;  %v529_v10 = vld [vmem:[%s1130_s7 + $0x68] sm:$0xff] }
  0x27   :  { %785 = vmatpush3.bf16.msra.mxu1 %v840_v30  ;;  %v528_v9 = vld [vmem:[%s1130_s7 + $0x60] sm:$0xff]  ;;  %v530_v11 = vld [vmem:[%s1130_s7 + $0x70] sm:$0xff]  ;;  %v531_v12 = vld [vmem:[%s1130_s7 + $0x78] sm:$0xff] }
  0x28   :  { %786 = vmatprep.subr.bf16.mxu1 %v871_v3  ;;  %v666_v13 = vld [vmem:[#allocation2] sm:$0x1] }
  0x29   :  { %801 = vmatpush3.bf16.msra.mxu0 %v846_v36  ;;  %v725_v14 = vld [vmem:[%s1129_s6] ss:$0 sm:$0xff]  ;;  %s874_s6 = smov [#allocation3]  }
  0x2a   :  { %802 = vmatprep.subr.bf16.mxu0 %v871_v3  ;;  %544 = vperm.xlu1 %815, %v518_v62   ;;  %v516_v21 = vld [vmem:[%s1130_s7] sm:$0xff] }
  0x2b   :  { %787 = vmatpush3.bf16.msra.mxu1 %v841_v31 }
  0x2c   :  { %788 = vmatprep.subr.bf16.mxu1 %v871_v3 }
  0x2d   :  { %803 = vmatpush3.bf16.msra.mxu0 %v847_v51 }
  0x2e   :  { %804 = vmatprep.subr.bf16.mxu0 %v871_v3  ;;  %549 = vperm.xlu1 %815, %v519_v63  }
  0x2f   :  { %789 = vmatpush3.bf16.msra.mxu1 %v842_v32 }
  0x30   :  { %790 = vmatprep.subr.bf16.mxu1 %v871_v3 }
  0x31   :  { %805 = vmatpush3.bf16.msra.mxu0 %v848_v52 }
  0x32   :  { %554 = vperm.xlu1 %815, %v520_v0  }
  0x33   :  { %791 = vmatpush3.bf16.msra.mxu1 %v843_v33 }
  0x34   :  { %792 = vmatprep.subr.bf16.mxu1 %v871_v3  ;;  %v523_v3 = vld [vmem:[%s1130_s7 + $0x38] sm:$0xff]  ;;  %s685_s7 = sshll.u32 %s874_s6, 4  ;;  %s686_s7 = int_to_ptr.vmem [resolvable:$true] %s685_s7 }
  0x35   :  { %s849_s1 = scalar_lea.vmem %s686_s7, 16  ;;  %s853_s12 = scalar_lea.vmem %s686_s7, 32 }
  0x36   :  { %559 = vperm.xlu1 %815, %v521_v1   ;;  %p850_p0 = scmp.ne.s32.totalorder %s686_s7, %s849_s1  ;;  %p854_p1 = scmp.lt.s32.totalorder %s686_s7, %s686_s7 }
  0x37   :  { %793 = vmatpush3.bf16.msra.mxu1 %v844_v34  ;;  %p855_p2 = scmp.lt.s32.totalorder %s853_s12, %s849_s1 }
  0x39   :  { %p856_p3 = por %p855_p2, %p854_p1 }
  0x3a   :  { %564 = vperm.xlu1 %815, %v522_v2  }
  0x3b   :  { %p857_p4 = pnand %p856_p3, %p850_p0 }
  0x3e   :  { %569 = vperm.xlu1 %815, %v523_v3  }
  0x42   :  { %574 = vperm.xlu1 %815, %v524_v4  }
  0x46   :  { %579 = vperm.xlu1 %815, %v525_v5  }
  0x4a   :  { %584 = vperm.xlu1 %815, %v526_v7  }
  0x4e   :  { %589 = vperm.xlu1 %815, %v527_v8  }
  0x52   :  { %594 = vperm.xlu1 %815, %v528_v9  }
  0x56   :  { %599 = vperm.xlu1 %815, %v529_v10  }
  0x5a   :  { %604 = vperm.xlu1 %815, %v530_v11  }
  0x5e   :  { %609 = vperm.xlu1 %815, %v531_v12  }
  0x62   :  { %669 = vperm.xlu1 %815, %v666_v13  }
  0xa1   :  { %v540_v28 = vpop.permute.xlu1 %539 }
  0xa5   :  { %v545_v30 = vpop.permute.xlu1 %544 }
  0xa9   :  { %v550_v32 = vpop.permute.xlu1 %549 }
  0xad   :  { %v555_v34 = vpop.permute.xlu1 %554 }
  0xcf   :  { %v279_v37 = vpop.f32.mrf.mxu1 }
  0xd1   :  { %v776_v38 = vpop.f32.mrf.mxu1 }
  0xd3   :  { %v282_v39 = vpop.f32.mrf.mxu1 }
  0xd5   :  { %v777_v40 = vpop.f32.mrf.mxu1 }
  0xe4   :  { %v747_v41 = vpop.f32.mrf.mxu0 }
  0xe6   :  { %v748_v43 = vpop.f32.mrf.mxu0 }
  0xe7   :  { %v749_v44 = vadd.f32 %v748_v43, %v747_v41 }
  0xe8   :  { %v750_v45 = vpop.f32.mrf.mxu0 }
  0xe9   :  { %v240_v46 = vadd.f32 %v749_v44, %v693_v42 }
  0xea   :  { %v751_v47 = vpop.f32.mrf.mxu0 }
  0xeb   :  { %v280_v48 = vadd.f32 %v279_v37, %v240_v46 }
  0xed   :  { %v285_v49 = vmax.f32 %v280_v48, 0.0 }
  0xef   :  { %v286_v50 = vpack.c.bf16 %v285_v49, %v285_v49 }
  0xf1   :  { %795 = vmatmul.mubr.bf16.vlgmr.msra.gmra.mxu1 %v286_v50 }
 0x1b1   :  { %v392_v54 = vpop.f32.mrf.mxu1 }
 0x1b2   :  { %v393_v55 = vadd.f32 %v716_v53, %v392_v54 }
 0x1b3   :  { %v796_v56 = vpop.f32.mrf.mxu1 }
 0x1b4   :  { %v398_v57 = vmax.f32 %v393_v55, 0.0 }
 0x1b5   :  { %v395_v58 = vpop.f32.mrf.mxu1 }
 0x1b6   :  { %v399_v59 = vpack.c.bf16 %v398_v57, %v398_v57 }
 0x1b7   :  { %v797_v60 = vpop.f32.mrf.mxu1 }
 0x1b8   :  { %807 = vmatmul.mubr.msk.bf16.vlgmr.msra.gmra.mxu0 %vm439_vm3, %v399_v59 }
 0x278   :  { %v477_v15 = vpop.f32.mrf.mxu0 }
 0x279   :  { %v478_v16 = vadd.f32 %v725_v14, %v477_v15 }
 0x27a   :  { %v808_v17 = vpop.f32.mrf.mxu0 }
 0x27b   :  { %v483_v18 = vmax.f32 %v478_v16, 0.0 }
 0x27c   :  { %v480_v19 = vpop.f32.mrf.mxu0 }
 0x27d   :  { %484 = vxpose.xlu0.b32.start.end [1/1] (short) %v483_v18, 128 }
 0x27e   :  { %v809_v20 = vpop.f32.mrf.mxu0 }
 0x2a6   :  { %814 = vset.pattern.permute.xlu0 %v872_v6  ;;  %v560_v6 = vpop.permute.xlu1 %559 }
 0x2aa   :  { %v565_v37 = vpop.permute.xlu1 %564 }
 0x2ae   :  { %v570_v39 = vpop.permute.xlu1 %569 }
 0x2b2   :  { %v575_v41 = vpop.permute.xlu1 %574 }
 0x2b6   :  { %v580_v43 = vpop.permute.xlu1 %579 }
 0x2ba   :  { %v585_v45 = vpop.permute.xlu1 %584 }
 0x2be   :  { %v590_v51 = vpop.permute.xlu1 %589 }
 0x2c2   :  { %v595_v61 = vpop.permute.xlu1 %594 }
 0x2c6   :  { %v600_v8 = vpop.permute.xlu1 %599 }
 0x2ca   :  { %v605_v18 = vpop.permute.xlu1 %604 }
 0x2e2   :  { %534 = vperm.xlu0 %814, %v516_v21  }
 0x2f9   :  { %v500_v22 = vpop.trf.xlu0 }
 0x2fd   :  { %v501_v23 = vpop.trf.xlu0 }
 0x2fe   :  { %v613_v47 = vmul.f32 %v540_v28, %v501_v23  ;;  %v610_v28 = vpop.permute.xlu1 %609 }
 0x300   :  { %v630_v52 = vsel %vm628_vm4, %v613_v47, 0.0 }
 0x301   :  { %v502_v24 = vpop.trf.xlu0 }
 0x302   :  { %v614_v49 = vmul.f32 %v545_v30, %v502_v24 }
 0x304   :  { %v632_v56 = vsel %vm628_vm4, %v614_v49, 0.0 }
 0x305   :  { %v503_v25 = vpop.trf.xlu0 }
 0x306   :  { %v615_v53 = vmul.f32 %v550_v32, %v503_v25 }
 0x308   :  { %v634_v59 = vsel %vm628_vm4, %v615_v53, 0.0 }
 0x309   :  { %v504_v26 = vpop.trf.xlu0 }
 0x30a   :  { %v616_v57 = vmul.f32 %v555_v34, %v504_v26 }
 0x30c   :  { %v636_v63 = vsel %vm628_vm4, %v616_v57, 0.0 }
 0x30d   :  { %v505_v27 = vpop.trf.xlu0 }
 0x30e   :  { %v617_v60 = vmul.f32 %v560_v6, %v505_v27  ;;  %v672_v6 = vlaneseq }
 0x310   :  { %v638_v2 = vsel %vm628_vm4, %v617_v60, 0.0 }
 0x311   :  { %v506_v29 = vpop.trf.xlu0 }
 0x312   :  { %v618_v0 = vmul.f32 %v565_v37, %v506_v29 }
 0x314   :  { %v640_v5 = vsel %vm628_vm4, %v618_v0, 0.0 }
 0x315   :  { %v507_v31 = vpop.trf.xlu0 }
 0x316   :  { %v619_v3 = vmul.f32 %v570_v39, %v507_v31 }
 0x318   :  { %v642_v10 = vsel %vm628_vm4, %v619_v3, 0.0 }
 0x319   :  { %v508_v33 = vpop.trf.xlu0 }
 0x31a   :  { %v620_v7 = vmul.f32 %v575_v41, %v508_v33 }
 0x31c   :  { %v644_v13 = vsel %vm628_vm4, %v620_v7, 0.0 }
 0x31d   :  { %v509_v35 = vpop.trf.xlu0 }
 0x31e   :  { %v621_v11 = vmul.f32 %v580_v43, %v509_v35  ;;  %v670_v43 = vpop.permute.xlu1 %669 }
 0x320   :  { %v646_v16 = vsel %vm628_vm4, %v621_v11, 0.0 }
 0x321   :  { %v510_v36 = vpop.trf.xlu0 }
 0x322   :  { %v622_v14 = vmul.f32 %v585_v45, %v510_v36 }
 0x324   :  { %v648_v20 = vsel %vm628_vm4, %v622_v14, 0.0 }
 0x325   :  { %v511_v38 = vpop.trf.xlu0 }
 0x326   :  { %v623_v17 = vmul.f32 %v590_v51, %v511_v38  ;;  %v673_v38 = vshrl.u32 %v672_v6, 7 }
 0x328   :  { %v650_v23 = vsel %vm628_vm4, %v623_v17, 0.0  ;;  %v674_v41 = vsub.s32 0, %v673_v38 }
 0x329   :  { %v512_v40 = vpop.trf.xlu0 }
 0x32a   :  { %v624_v21 = vmul.f32 %v595_v61, %v512_v40  ;;  %v675_v45 = vrot.slane %v670_v43, %v674_v41 }
 0x32c   :  { %v652_v26 = vsel %vm628_vm4, %v624_v21, 0.0 }
 0x32d   :  { %v513_v42 = vpop.trf.xlu0 }
 0x32e   :  { %v625_v24 = vmul.f32 %v600_v8, %v513_v42 }
 0x330   :  { %v654_v30 = vsel %vm628_vm4, %v625_v24, 0.0 }
 0x331   :  { %v514_v44 = vpop.trf.xlu0 }
 0x332   :  { %v626_v27 = vmul.f32 %v605_v18, %v514_v44 }
 0x334   :  { %v656_v33 = vsel %vm628_vm4, %v626_v27, 0.0 }
 0x335   :  { %v515_v46 = vpop.trf.xlu0 }
 0x336   :  { %v627_v31 = vmul.f32 %v610_v28, %v515_v46 }
 0x338   :  { %v658_v35 = vsel %vm628_vm4, %v627_v31, 0.0 }
 0x35d   :  { %v535_v48 = vpop.permute.xlu0 %534 }
 0x35e   :  { %v612_v50 = vmul.f32 %v535_v48, %v500_v22 }
 0x360   :  { %v629_v54 = vsel %vm628_vm4, %v612_v50, 0.0 }
 0x361   :  { %v631_v55 = vadd.f32 %v630_v52, %v629_v54 }
 0x363   :  { %v633_v58 = vadd.f32 %v632_v56, %v631_v55 }
 0x365   :  { %v635_v62 = vadd.f32 %v634_v59, %v633_v58 }
 0x367   :  { %v637_v1 = vadd.f32 %v636_v63, %v635_v62 }
 0x369   :  { %v639_v4 = vadd.f32 %v638_v2, %v637_v1 }
 0x36b   :  { %v641_v9 = vadd.f32 %v640_v5, %v639_v4 }
 0x36d   :  { %v643_v12 = vadd.f32 %v642_v10, %v641_v9 }
 0x36f   :  { %v645_v15 = vadd.f32 %v644_v13, %v643_v12 }
 0x371   :  { %v647_v19 = vadd.f32 %v646_v16, %v645_v15 }
 0x373   :  { %v649_v22 = vadd.f32 %v648_v20, %v647_v19 }
 0x375   :  { %v651_v25 = vadd.f32 %v650_v23, %v649_v22 }
 0x377   :  { %v653_v29 = vadd.f32 %v652_v26, %v651_v25 }
 0x379   :  { %v655_v32 = vadd.f32 %v654_v30, %v653_v29 }
 0x37b   :  { %v657_v34 = vadd.f32 %v656_v33, %v655_v32 }
 0x37d   :  { %v659_v36 = vadd.f32 %v658_v35, %v657_v34 }
 0x37f   :  { %v660_v37 = vrot.slane %v659_v36, 4 }
 0x381   :  { %v661_v39 = vadd.f32 %v660_v37, %v659_v36 }
 0x383   :  { %v662_v40 = vrot.slane %v661_v39, 2 }
 0x385   :  { %v663_v42 = vadd.f32 %v662_v40, %v661_v39 }
 0x387   :  { %v664_v44 = vrot.slane %v663_v42, 1 }
 0x389   :  { %v665_v46 = vadd.f32 %v664_v44, %v663_v42 }
 0x38b   :  { %v676_v47 = vadd.f32 %v675_v45, %v665_v46 }
 0x38d   :  { %678 = vst.msk [vmem:[#allocation3] sm:$0x1] %vm677_vm5, %v676_v47 }
 0x38e   :  { %860 = shalt.err (!%p857_p4)
}
 0x38f   :  { %688 = dma.vmem_to_hbm [thread:$0]  %s686_s7, 16, %s1132_s9, [#allocation4]  }
 0x390   :  { %869 = dma.done.wait [#allocation4], 16  }
 0x391   :  { %870 = vsyncadd [#allocation4], 4294967280 }
 0x392   :  { %692 = vsyncpa [#allocation4], 1 }

</bundles_post_ra>
